<compile_context>
chip_gen: v7x
topology: tpu7x:2x2x1
jax: 0.10.0
libtpu: 0.0.40
codegen_flags: <defaults>
</compile_context>

<pallas_src>
import functools

import jax
import jax.numpy as jnp
from jax import lax
from jax.experimental import pallas as pl
from jax.experimental.pallas import tpu as pltpu


def autoencoder_kernel(x_ref, w_ref, b_ref, out_ref, *,
                       layer_dims, row_offsets, compute_dtype):
    """Full encoder+decoder forward for one lane-packed batch tile.

    w_ref is a single row-stacked slab of per-layer block-diagonal weights,
    b_ref one bias row per layer.  Every activation stays lane-dense; no
    in-kernel reshapes.
    """
    n_layers = len(layer_dims)
    h = x_ref[...]
    for li, ((din, dout), off) in enumerate(zip(layer_dims, row_offsets)):
        w = w_ref[off:off + din, 0:dout].astype(compute_dtype)
        z = jnp.dot(h.astype(compute_dtype), w,
                    preferred_element_type=jnp.float32)
        z = z + b_ref[li:li + 1, 0:dout]          # bias kept in f32
        if li == n_layers - 1:
            h = jax.nn.sigmoid(z)                  # final Sigmoid
        else:
            h = jnp.maximum(z, 0.0)                # ReLU (Dropout = identity in eval)
    out_ref[...] = h.astype(out_ref.dtype)


def _round_up(x, m):
    return (x + m - 1) // m * m


def _pack_params(params, pack):
    """Block-diagonal pack-x replication of each Linear layer, staged into one
    row-stacked weight slab + one bias slab (both f32 HBM storage)."""
    layer_dims, row_offsets, w_blocks, b_rows = [], [], [], []
    off = 0
    for w, b in params:
        w = jnp.asarray(w, jnp.float32)
        b = jnp.asarray(b, jnp.float32).reshape(1, -1)
        if pack > 1:
            w = jnp.kron(jnp.eye(pack, dtype=jnp.float32), w)   # block-diagonal
            b = jnp.tile(b, (1, pack))
        din, dout = int(w.shape[0]), int(w.shape[1])
        layer_dims.append((din, dout))
        row_offsets.append(off)
        w_blocks.append(w)
        b_rows.append(b)
        off = _round_up(off + din, 8)          # keep every block sublane-aligned
    total_rows = _round_up(off, 8)
    width = _round_up(max(d for _, d in layer_dims), 128)

    w_slab = jnp.zeros((total_rows, width), jnp.float32)
    for o, w in zip(row_offsets, w_blocks):
        w_slab = w_slab.at[o:o + w.shape[0], :w.shape[1]].set(w)
    b_slab = jnp.zeros((len(params), width), jnp.float32)
    for i, b in enumerate(b_rows):
        b_slab = b_slab.at[i, :b.shape[1]].set(b[0])
    return w_slab, b_slab, tuple(layer_dims), tuple(row_offsets)


def _choose_bm(rows, *, sublane=8, cap=1024, min_grid=4):
    """Largest multiple-of-`sublane` divisor of `rows` that is <= cap and (when
    possible) leaves >= `min_grid` grid steps so the BlockSpec pipeline can
    overlap output writeback with the next input fetch."""
    if rows <= sublane:
        return rows
    target = min(cap, rows)
    if rows >= sublane * min_grid:
        target = min(target, rows // min_grid)
    best = None
    m = sublane
    while m <= target:
        if rows % m == 0:
            best = m
        m += sublane
    # Fallback: a full-array block is always legal (last-two-dims exception).
    return best if best is not None else rows


def autoencoder_forward(x, params, *, bm=None):
    """x: [B, D]. params: list of (W[in, out], b[1, out]) for the 6 Linear layers.

    Activation HBM storage follows x.dtype (f32 or bf16); weights/biases always
    stay in f32 HBM.  On the bf16 path the MXU is fed bf16 operands with f32
    accumulation; the f32 path keeps f32 MXU operands for exactness.
    """
    B, D = x.shape
    storage_dtype = x.dtype
    itemsize = jnp.dtype(storage_dtype).itemsize
    compute_dtype = jnp.bfloat16 if storage_dtype == jnp.bfloat16 else jnp.float32

    # ---- lane-dense packing: fold `pack` logical rows into one 128-lane row.
    pack = 1
    if D < 128 and 128 % D == 0 and B % (128 // D) == 0:
        pack = 128 // D
    rows, lane = B // pack, D * pack
    x_p = x.reshape(rows, lane)            # free: row-major contiguous in HBM

    w_slab, b_slab, layer_dims, row_offsets = _pack_params(params, pack)

    sublane = 16 if storage_dtype == jnp.bfloat16 else 8
    if bm is None:
        bm = _choose_bm(rows, sublane=sublane)
    assert rows % bm == 0, "tile rows must divide packed batch rows"

    kernel = functools.partial(
        autoencoder_kernel,
        layer_dims=layer_dims,
        row_offsets=row_offsets,
        compute_dtype=compute_dtype)

    flops = 2 * rows * sum(din * dout for din, dout in layer_dims)
    slab_bytes = int(w_slab.size + b_slab.size) * 4
    cost = pl.CostEstimate(
        flops=int(flops),
        transcendentals=int(2 * B * D),                 # exp + reciprocal in sigmoid
        bytes_accessed=int(2 * B * D * itemsize + slab_bytes),
    )

    out_p = pl.pallas_call(
        kernel,
        out_shape=jax.ShapeDtypeStruct((rows, lane), storage_dtype),
        grid=(rows // bm,),
        in_specs=[
            pl.BlockSpec((bm, lane), lambda i: (i, 0)),
            # Grid-invariant full-array blocks -> slabs stay resident in VMEM.
            pl.BlockSpec(w_slab.shape, lambda i: (0, 0)),
            pl.BlockSpec(b_slab.shape, lambda i: (0, 0)),
        ],
        out_specs=pl.BlockSpec((bm, lane), lambda i: (i, 0)),
        compiler_params=pltpu.CompilerParams(
            dimension_semantics=("parallel",)),
        cost_estimate=cost,
    )(x_p, w_slab, b_slab)
    return out_p.reshape(B, D)


def init_params(key, input_dim, hidden_dims):
    """Deterministic init mimicking nn.Linear default (uniform +/- 1/sqrt(fan_in))."""
    enc = hidden_dims[: len(hidden_dims) // 2 + 1]          # [64, 32, 16]
    dec = hidden_dims[len(hidden_dims) // 2 + 1:]           # [32, 64]
    dims = [input_dim] + enc + dec + [input_dim]            # [D,64,32,16,32,64,D]
    params = []
    for i in range(len(dims) - 1):
        key, kw, kb = jax.random.split(key, 3)
        fan_in, fan_out = dims[i], dims[i + 1]
        bound = 1.0 / (fan_in ** 0.5)
        w = jax.random.uniform(kw, (fan_in, fan_out), jnp.float32, -bound, bound)
        b = jax.random.uniform(kb, (1, fan_out), jnp.float32, -bound, bound)
        params.append((w, b))
    return params


def reference_forward(x, params):
    """Plain-JAX reference (eval mode: dropout = identity), true-f32 matmuls."""
    h = x
    for i, (w, b) in enumerate(params):
        h = jnp.dot(h, w, precision=lax.Precision.HIGHEST) + b
        h = jax.nn.sigmoid(h) if i == len(params) - 1 else jnp.maximum(h, 0.0)
    return h


if __name__ == "__main__":
    key = jax.random.PRNGKey(0)
    input_dim = 32
    hidden_dims = [64, 32, 16, 32, 64]

    key, kparams, kx = jax.random.split(key, 3)
    params = init_params(kparams, input_dim, hidden_dims)

    # [512, 32] packs to a lane-dense [128, 128] slab -> bm=32 packed rows
    # (128 logical rows per tile) and a 4-step pipelined, parallel grid.
    B = 512
    x = jax.random.uniform(kx, (B, input_dim), jnp.float32)

    ref = reference_forward(x, params)

    # f32 storage / f32 MXU path
    out = autoencoder_forward(x, params)
    jax.block_until_ready(out)
    assert out.shape == (B, input_dim)
    assert jnp.allclose(out, ref, atol=1e-4, rtol=1e-4), "f32 mismatch vs reference"

    # bf16 activation storage / bf16 MXU feed / f32 accumulation path
    out_bf16 = autoencoder_forward(x.astype(jnp.bfloat16), params)
    jax.block_until_ready(out_bf16)
    assert out_bf16.shape == (B, input_dim)
    assert jnp.allclose(out_bf16.astype(jnp.float32), ref, atol=5e-2), \
        "bf16 storage path diverged beyond bf16 tolerance"

    print("KERNEL_OK")
</pallas_src>

<mosaic_0001>
module attributes {stable_mosaic.version = 11 : i64} {
  func.func @autoencoder_kernel(%arg0: i32, %arg1: memref<32x128xf32, #tpu.memory_space<vmem>>, %arg2: memref<960x256xf32, #tpu.memory_space<vmem>>, %arg3: memref<6x256xf32, #tpu.memory_space<vmem>>, %arg4: memref<32x128xf32, #tpu.memory_space<vmem>>) attributes {dimension_semantics = [#tpu.dimension_semantics<parallel>], iteration_bounds = array<i64: 4>, scalar_prefetch = 0 : i64, scratch_operands = 0 : i64, tpu.core_type = #tpu.core_type<tc>, window_params = [{transform_indices = @transform_0, window_bounds = array<i64: 32, 128>}, {pipeline_mode = #tpu.pipeline_mode<synchronous>, transform_indices = @transform_1, window_bounds = array<i64: 960, 256>}, {pipeline_mode = #tpu.pipeline_mode<synchronous>, transform_indices = @transform_2, window_bounds = array<i64: 6, 256>}, {transform_indices = @transform_3, window_bounds = array<i64: 32, 128>}]} {
    %c0 = arith.constant 0 : index
    %c0_0 = arith.constant 0 : index
    %0 = vector.load %arg1[%c0, %c0_0] : memref<32x128xf32, #tpu.memory_space<vmem>>, vector<32x128xf32>
    %c0_1 = arith.constant 0 : index
    %c0_2 = arith.constant 0 : index
    %1 = vector.load %arg2[%c0_1, %c0_2] : memref<960x256xf32, #tpu.memory_space<vmem>>, vector<128x256xf32>
    %cst = arith.constant dense<0.000000e+00> : vector<32x256xf32>
    %2 = tpu.matmul %0, %1, %cst {dimension_numbers = #tpu.dot_dimension_numbers<[1], [0], [0], [1], [0, 0, 1, 1], [], []>} : vector<32x128xf32>, vector<128x256xf32>, vector<32x256xf32> -> vector<32x256xf32>
    %c0_3 = arith.constant 0 : index
    %c0_4 = arith.constant 0 : index
    %3 = vector.load %arg3[%c0_3, %c0_4] : memref<6x256xf32, #tpu.memory_space<vmem>>, vector<1x256xf32>
    %4 = vector.broadcast %3 : vector<1x256xf32> to vector<32x256xf32>
    %5 = arith.addf %2, %4 : vector<32x256xf32>
    %cst_5 = arith.constant 0.000000e+00 : f32
    %6 = vector.broadcast %cst_5 : f32 to vector<32x256xf32>
    %7 = arith.maximumf %5, %6 : vector<32x256xf32>
    %c128 = arith.constant 128 : index
    %c0_6 = arith.constant 0 : index
    %8 = vector.load %arg2[%c128, %c0_6] : memref<960x256xf32, #tpu.memory_space<vmem>>, vector<256x128xf32>
    %cst_7 = arith.constant dense<0.000000e+00> : vector<32x128xf32>
    %9 = tpu.matmul %7, %8, %cst_7 {dimension_numbers = #tpu.dot_dimension_numbers<[1], [0], [0], [1], [0, 0, 1, 1], [], []>} : vector<32x256xf32>, vector<256x128xf32>, vector<32x128xf32> -> vector<32x128xf32>
    %c1 = arith.constant 1 : index
    %c0_8 = arith.constant 0 : index
    %10 = vector.load %arg3[%c1, %c0_8] : memref<6x256xf32, #tpu.memory_space<vmem>>, vector<1x128xf32>
    %11 = vector.broadcast %10 : vector<1x128xf32> to vector<32x128xf32>
    %12 = arith.addf %9, %11 : vector<32x128xf32>
    %cst_9 = arith.constant 0.000000e+00 : f32
    %13 = vector.broadcast %cst_9 : f32 to vector<32x128xf32>
    %14 = arith.maximumf %12, %13 : vector<32x128xf32>
    %c384 = arith.constant 384 : index
    %c0_10 = arith.constant 0 : index
    %15 = vector.load %arg2[%c384, %c0_10] : memref<960x256xf32, #tpu.memory_space<vmem>>, vector<128x64xf32>
    %cst_11 = arith.constant dense<0.000000e+00> : vector<32x64xf32>
    %16 = tpu.matmul %14, %15, %cst_11 {dimension_numbers = #tpu.dot_dimension_numbers<[1], [0], [0], [1], [0, 0, 1, 1], [], []>} : vector<32x128xf32>, vector<128x64xf32>, vector<32x64xf32> -> vector<32x64xf32>
    %c2 = arith.constant 2 : index
    %c0_12 = arith.constant 0 : index
    %17 = vector.load %arg3[%c2, %c0_12] : memref<6x256xf32, #tpu.memory_space<vmem>>, vector<1x64xf32>
    %18 = vector.broadcast %17 : vector<1x64xf32> to vector<32x64xf32>
    %19 = arith.addf %16, %18 : vector<32x64xf32>
    %cst_13 = arith.constant 0.000000e+00 : f32
    %20 = vector.broadcast %cst_13 : f32 to vector<32x64xf32>
    %21 = arith.maximumf %19, %20 : vector<32x64xf32>
    %c512 = arith.constant 512 : index
    %c0_14 = arith.constant 0 : index
    %22 = vector.load %arg2[%c512, %c0_14] : memref<960x256xf32, #tpu.memory_space<vmem>>, vector<64x128xf32>
    %cst_15 = arith.constant dense<0.000000e+00> : vector<32x128xf32>
    %23 = tpu.matmul %21, %22, %cst_15 {dimension_numbers = #tpu.dot_dimension_numbers<[1], [0], [0], [1], [0, 0, 1, 1], [], []>} : vector<32x64xf32>, vector<64x128xf32>, vector<32x128xf32> -> vector<32x128xf32>
    %c3 = arith.constant 3 : index
    %c0_16 = arith.constant 0 : index
    %24 = vector.load %arg3[%c3, %c0_16] : memref<6x256xf32, #tpu.memory_space<vmem>>, vector<1x128xf32>
    %25 = vector.broadcast %24 : vector<1x128xf32> to vector<32x128xf32>
    %26 = arith.addf %23, %25 : vector<32x128xf32>
    %cst_17 = arith.constant 0.000000e+00 : f32
    %27 = vector.broadcast %cst_17 : f32 to vector<32x128xf32>
    %28 = arith.maximumf %26, %27 : vector<32x128xf32>
    %c576 = arith.constant 576 : index
    %c0_18 = arith.constant 0 : index
    %29 = vector.load %arg2[%c576, %c0_18] : memref<960x256xf32, #tpu.memory_space<vmem>>, vector<128x256xf32>
    %cst_19 = arith.constant dense<0.000000e+00> : vector<32x256xf32>
    %30 = tpu.matmul %28, %29, %cst_19 {dimension_numbers = #tpu.dot_dimension_numbers<[1], [0], [0], [1], [0, 0, 1, 1], [], []>} : vector<32x128xf32>, vector<128x256xf32>, vector<32x256xf32> -> vector<32x256xf32>
    %c4 = arith.constant 4 : index
    %c0_20 = arith.constant 0 : index
    %31 = vector.load %arg3[%c4, %c0_20] : memref<6x256xf32, #tpu.memory_space<vmem>>, vector<1x256xf32>
    %32 = vector.broadcast %31 : vector<1x256xf32> to vector<32x256xf32>
    %33 = arith.addf %30, %32 : vector<32x256xf32>
    %cst_21 = arith.constant 0.000000e+00 : f32
    %34 = vector.broadcast %cst_21 : f32 to vector<32x256xf32>
    %35 = arith.maximumf %33, %34 : vector<32x256xf32>
    %c704 = arith.constant 704 : index
    %c0_22 = arith.constant 0 : index
    %36 = vector.load %arg2[%c704, %c0_22] : memref<960x256xf32, #tpu.memory_space<vmem>>, vector<256x128xf32>
    %cst_23 = arith.constant dense<0.000000e+00> : vector<32x128xf32>
    %37 = tpu.matmul %35, %36, %cst_23 {dimension_numbers = #tpu.dot_dimension_numbers<[1], [0], [0], [1], [0, 0, 1, 1], [], []>} : vector<32x256xf32>, vector<256x128xf32>, vector<32x128xf32> -> vector<32x128xf32>
    %c5 = arith.constant 5 : index
    %c0_24 = arith.constant 0 : index
    %38 = vector.load %arg3[%c5, %c0_24] : memref<6x256xf32, #tpu.memory_space<vmem>>, vector<1x128xf32>
    %39 = vector.broadcast %38 : vector<1x128xf32> to vector<32x128xf32>
    %40 = arith.addf %37, %39 : vector<32x128xf32>
    %41 = arith.negf %40 : vector<32x128xf32>
    %42 = math.exp %41 : vector<32x128xf32>
    %cst_25 = arith.constant 1.000000e+00 : f32
    %43 = vector.broadcast %cst_25 : f32 to vector<32x128xf32>
    %44 = arith.addf %43, %42 : vector<32x128xf32>
    %45 = arith.divf %43, %44 : vector<32x128xf32>
    %c0_26 = arith.constant 0 : index
    %c0_27 = arith.constant 0 : index
    %46 = vector.load %arg4[%c0_26, %c0_27] : memref<32x128xf32, #tpu.memory_space<vmem>>, vector<32x128xf32>
    tpu.vector_store %arg4[%c0_26, %c0_27], %45 {strides = array<i32>} : memref<32x128xf32, #tpu.memory_space<vmem>>, vector<32x128xf32>,
    return
  }
  func.func @transform_0(%arg0: i32) -> (i32, i32) {
    %c0_i32 = arith.constant 0 : i32
    %c0_i32_0 = arith.constant 0 : i32
    return %arg0, %c0_i32 : i32, i32
  }
  func.func @transform_1(%arg0: i32) -> (i32, i32) {
    %c0_i32 = arith.constant 0 : i32
    %c0_i32_0 = arith.constant 0 : i32
    %c0_i32_1 = arith.constant 0 : i32
    return %c0_i32, %c0_i32_0 : i32, i32
  }
  func.func @transform_2(%arg0: i32) -> (i32, i32) {
    %c0_i32 = arith.constant 0 : i32
    %c0_i32_0 = arith.constant 0 : i32
    %c0_i32_1 = arith.constant 0 : i32
    return %c0_i32, %c0_i32_0 : i32, i32
  }
  func.func @transform_3(%arg0: i32) -> (i32, i32) {
    %c0_i32 = arith.constant 0 : i32
    %c0_i32_0 = arith.constant 0 : i32
    return %arg0, %c0_i32 : i32, i32
  }
}

</mosaic_0001>

<bundles_post_ra>
// kernel: tpu_custom_call.1
= control target key start
LH: loop header
LB: loop body
LE: loop exit
PB: predicated region body
PF: predicated region fallthrough
CT: control target
= control target key end

     0   :  { %8 = vsyncpa [#allocation3], 0  ;;  %s2018_s0 = inlined_call_operand.hbm [shape: f32[128,128], index: 0, kind: input, shape index: {}]   ;;  %s2019_s1 = inlined_call_operand.hbm [shape: f32[960,256], index: 1, kind: input, shape index: {}]   ;;  %s2020_s2 = inlined_call_operand.hbm [shape: f32[6,256], index: 2, kind: input, shape index: {}]   ;;  %s2021_s3 = inlined_call_operand.hbm [shape: f32[128,128], index: 3, kind: output, shape index: {}]  }
   0x1   :  { %10 = vsyncpa [#allocation3 + $0x1], 0 }
   0x2   :  { %11 = vsyncpa [#allocation6], 0 }
   0x3   :  { %12 = vsyncpa [#allocation4], 0 }
   0x4   :  { %14 = vsyncpa [#allocation4 + $0x1], 0  ;;  %s1759_s12 = smov 0   ;;  %s1761_s13 = smov 0  }
   0x5   :  { %s1763_s14 = smov 0   ;;  %s1765_s15 = smov 0  }
   0x6 LB: > { %s1780_s16 = sadd.s32 4294967295, %s1726_s15   ;;  %s1096_s17 = sadd.s32 4294967294, %s1726_s15   ;;  %s1726_s15 = sphi %s1765_s15, %s2040_s15   ;;  %s1722_s14 = sphi %s1763_s14, %s2039_s14   ;;  %s1718_s13 = sphi %s1761_s13, %s2038_s13   ;;  %s1714_s12 = sphi %s1759_s12, %s2037_s12  }
   0x7   : > { %p40_p0 = scmp.ne.s32.totalorder %s1718_s13, %s1714_s12  ;;  %p2022_p1 = scmp.eq.s32.totalorder %s1780_s16, 0 }
   0x8   : > { %p112_p3 = scmp.eq.s32.totalorder %s1096_s17, 3  ;;  %p1097_p5 = scmp.ge.s32.totalorder %s1726_s15, 1 }
   0x9   : > { %p1789_p4 = por %p2022_p1, %p40_p0  ;;  %p119_p7 = scmp.lt.s32.totalorder %s1726_s15, 5 }
   0xa   : > { %p1794_p6 = por %p112_p3, %p40_p0  ;;  %s1728_s21 = smov [#allocation5]  }
   0xb   : > { %s2025_s18 = scalar_select %p1789_p4, 1, 0 }
   0xc   : > { %s2026_s19 = scalar_select %p1794_p6, 1, 0 }
   0xd   : > { %p1799_p8 = pnand %p1097_p5, %p119_p7  ;;  %s131_s22 = sshll.u32 %s1728_s21, 4  ;;  %s132_s22 = int_to_ptr.vmem [resolvable:$true] %s131_s22 }
   0xe   : > { %s1729_s24 = smov [#allocation7]   ;;  %s1570_s28 = scalar_lea.hbm %s2019_s1, 30720 }
   0xf   : > { %s2027_s20 = scalar_select %p1799_p8, 1, 0 }
  0x10   : > { %p1492_p9 = pneg %p1799_p8  ;;  %s145_s25 = sshll.u32 %s1729_s24, 4  ;;  %s1811_s25 = int_to_ptr.vmem [resolvable:$true] %s145_s25 }
  0x11   : > { %p1571_p11 = scmp.ne.s32.totalorder %s2019_s1, %s1570_s28  ;;  %p1577_p3 = scmp.lt.u32.totalorder %s1570_s28, %s2019_s1 }
  0x12   : > { %p1807_p10 = pnand %p1492_p9, %p2022_p1 }
  0x14   : > { %p1572_p12 = pneg %p1807_p10 }
  0x16   : > { %p1573_p13 = pnand %p1572_p12, %p1571_p11 }
  0x18   : > { %p1574_p0 = pneg %p1573_p13 }
  0x1a   : > { %p1579_p5 = pnand %p1577_p3, %p1574_p0 }
  0x1c   : > { %1582 = shalt.err (!%p1579_p5)
}
  0x1d   : > { %s1583_s6 = scalar_lea.vmem %s132_s22, 30720  ;;  %p1591_p2 = scmp.lt.s32.totalorder %s132_s22, %s132_s22 }
  0x1e   : > { %p1584_p7 = scmp.ne.s32.totalorder %s132_s22, %s1583_s6  ;;  %p1592_p6 = scmp.lt.s32.totalorder %s1583_s6, %s1583_s6 }
  0x20   : > { %p1586_p9 = pnand %p1584_p7, %p1572_p12  ;;  %p1593_p4 = por %p1592_p6, %p1591_p2 }
  0x22   : > { %p1587_p1 = pneg %p1586_p9 }
  0x24   : > { %p1594_p8 = pnand %p1593_p4, %p1587_p1 }
  0x26   : > { %1597 = shalt.err (!%p1594_p8)
}
  0x27   : > { %s1730_s7 = smov 256   ;;  %s1731_s8 = smov 16  }
  0x28   : > { %1495 = dma.hbm_to_vmem [thread:$0]  (!%p1807_p10), %s2019_s1, 30720, %s132_s22, [#allocation6], %s1730_s7, %s1730_s7, %s1731_s8  }
  0x29   : > { %s1598_s21 = scalar_lea.hbm %s2020_s2, 256 }
  0x2a   : > { %p1599_p11 = scmp.ne.s32.totalorder %s2020_s2, %s1598_s21  ;;  %p1605_p4 = scmp.lt.u32.totalorder %s1598_s21, %s2020_s2 }
  0x2c   : > { %p1601_p1 = pnand %p1599_p11, %p1572_p12 }
  0x2e   : > { %p1602_p2 = pneg %p1601_p1 }
  0x30   : > { %p1607_p6 = pnand %p1605_p4, %p1602_p2 }
  0x32   : > { %1610 = shalt.err (!%p1607_p6)
}
  0x33   : > { %s1611_s22 = scalar_lea.vmem %s1811_s25, 256  ;;  %p1619_p3 = scmp.lt.s32.totalorder %s1811_s25, %s1811_s25 }
  0x34   : > { %p1612_p8 = scmp.ne.s32.totalorder %s1811_s25, %s1611_s22  ;;  %p1620_p5 = scmp.lt.s32.totalorder %s1611_s22, %s1611_s22 }
  0x36   : > { %p1614_p13 = pnand %p1612_p8, %p1572_p12  ;;  %p1621_p7 = por %p1620_p5, %p1619_p3 }
  0x38   : > { %p1615_p0 = pneg %p1614_p13 }
  0x3a   : > { %p1622_p9 = pnand %p1621_p7, %p1615_p0 }
  0x3c   : > { %1625 = shalt.err (!%p1622_p9)
}
  0x3d   : > { %1498 = dma.hbm_to_vmem [thread:$0]  (!%p1807_p10), %s2020_s2, 256, %s1811_s25, [#allocation6]  }
  0x3e   : > { %s1861_s4 = sadd.s32 1, %s1726_s15   ;;  %s27_s23 = sadd.s32 1, %s1722_s14 }
  0x3f   : > { %s24_s5 = ssub.s32 %s1726_s15, %s1861_s4  ;;  %p34_p12 = scmp.ne.s32.totalorder %s1722_s14, %s1718_s13 }
  0x40   : > { %p25_p11 = scmp.eq.s32.totalorder %s24_s5, 0  ;;  %p35_p1 = scmp.eq.s32.totalorder %s1726_s15, 0 }
  0x41   : > { %p2029_p2 = scmp.eq.s32.totalorder %s1780_s16, 3  ;;  %p1509_p6 = scmp.lt.s32.totalorder %s1726_s15, 4 }
  0x42   : > { %s1877_s7 = scalar_select %p25_p11, %s1722_s14, %s27_s23  }
  0x43   : > { %p1871_p4 = por %p2029_p2, %p34_p12  ;;  %p36_p8 = por %p35_p1, %p34_p12 }
  0x44   : > { %s156_s8 = sand.u32 1, %s1722_s14   ;;  %s1122_s25 = sshll.u32 %s1726_s15, 9 }
  0x45   : > { %s1101_s9 = sshll.u32 %s156_s8, 5  ;;  %s1884_s17 = scalar_lea.hbm %s2018_s0, %s1122_s25 }
  0x46   : > { %s160_s21 = scalar_lea.vmem [#allocation2], %s1101_s9  ;;  %p1888_p10 = pnand %p1509_p6, %p36_p8 }
  0x47   : > { %s167_s24 = sshll.u32 %s160_s21, 4  ;;  %s1892_s27 = scalar_lea.sflag [#allocation3], %s156_s8  ;;  %s1886_s24 = int_to_ptr.vmem [resolvable:$true] %s167_s24 }
  0x48   : > { %s1626_s28 = scalar_lea.hbm %s1884_s17, 512  ;;  %p1628_p0 = pneg %p1888_p10 }
  0x49   : > { %p1627_p13 = scmp.ne.s32.totalorder %s1884_s17, %s1626_s28  ;;  %s1631_s30 = scalar_lea.hbm %s2018_s0, 2048 }
  0x4a   : > { %p1632_p7 = scmp.lt.u32.totalorder %s1884_s17, %s2018_s0  ;;  %p1633_p9 = scmp.lt.u32.totalorder %s1631_s30, %s1626_s28 }
  0x4b   : > { %p1629_p3 = pnand %p1628_p0, %p1627_p13  ;;  %p1635_p11 = scmp.lt.u32.totalorder %s1626_s28, %s1884_s17 }
  0x4c   : > { %p1634_p12 = por %p1633_p9, %p1632_p7 }
  0x4d   : > { %p1630_p5 = pneg %p1629_p3 }
  0x4e   : > { %p1636_p1 = por %p1635_p11, %p1634_p12 }
  0x50   : > { %p1637_p2 = pnand %p1636_p1, %p1630_p5 }
  0x52   : > { %1640 = shalt.err (!%p1637_p2)
}
  0x53   : > { %s1641_s8 = scalar_lea.vmem %s1886_s24, 512  ;;  %s1732_s9 = smov [#allocation2]  }
  0x54   : > { %p1642_p6 = scmp.ne.s32.totalorder %s1886_s24, %s1641_s8  ;;  %s1646_s25 = sshll.u32 %s1732_s9, 4  ;;  %s1647_s25 = int_to_ptr.vmem [resolvable:$false] %s1646_s25 }
  0x55   : > { %s1648_s10 = scalar_lea.vmem %s1647_s25, 1024  ;;  %p1649_p3 = scmp.lt.s32.totalorder %s1886_s24, %s1647_s25 }
  0x56   : > { %p1644_p8 = pnand %p1642_p6, %p1628_p0  ;;  %p1650_p7 = scmp.lt.s32.totalorder %s1648_s10, %s1641_s8 }
  0x58   : > { %p1645_p13 = pneg %p1644_p8  ;;  %p1651_p9 = por %p1650_p7, %p1649_p3 }
  0x5a   : > { %p1652_p12 = pnand %p1651_p9, %p1645_p13 }
  0x5c   : > { %1655 = shalt.err (!%p1652_p12)
}
  0x5d   : > { %s1733_s11 = smov 128   ;;  %s1734_s21 = smov 8  }
  0x5e   : > { %1502 = dma.hbm_to_vmem [thread:$0]  (!%p1888_p10), %s1884_s17, 512, %s1886_s24, %s1892_s27, %s1733_s11, %s1733_s11, %s1734_s21  }
  0x5f   : > { %p2032_p0 = scmp.ne.s32.totalorder %s2027_s20, 0 }
  0x60   : > { %s1923_s28 = sand.u32 (!%p2032_p0), 1, %s1718_s13   ;;  %p2033_p5 = scmp.ne.s32.totalorder (!%p2032_p0), %s2025_s18, 0 }
  0x61   : > { %179 = sbr.rel (%p2032_p0) target bundleno = 1507 (0x5e3), region = 32  ;;  %s1105_s22 = sshll.u32 (!%p2032_p0), %s1923_s28, 5 }
  0x62   : > { %s182_s29 = scalar_lea.sflag (!%p2032_p0), [#allocation3], %s1923_s28  ;;  %s1929_s30 = scalar_lea.vmem (!%p2032_p0), [#allocation2], %s1105_s22 }
  0x68   : > { %1701 = dma.done.wait (%p2033_p5), %s182_s29, 512  }
  0x69   : > { %1703 = vsyncadd (%p2033_p5), %s182_s29, 4294966784  ;;  %p2034_p10 = scmp.eq.s32.totalorder %s1780_s16, 0 }
  0x6b   : > { %1705 = dma.done.wait (%p2034_p10), [#allocation6], 30976   ;;  %p2035_p11 = pmov %p2034_p10 }
  0x6c   : > { %v1735_v0 = vmov 0.0   ;;  %v223_v1 = vld [vmem:[#allocation5 + $0x8] sm:$0xff]  ;;  %v225_v2 = vld [vmem:[#allocation5 + $0x18] sm:$0xff]  ;;  %v222_v3 = vld [vmem:[#allocation5] sm:$0xff]  ;;  %vm600_vm0 = vcmask 523264   ;;  %s215_s18 = scalar_lea.vmem [#allocation8], %s1105_s22 }
  0x6d   : > { %1707 = vsyncadd (%p2035_p11), [#allocation6], 4294936320  ;;  %330 = vmatprep.mubr.f32.mxu0 %v1735_v0  ;;  %v1304_v4 = vpack.c.bf16 %v225_v2, %v223_v1  ;;  %v224_v5 = vld [vmem:[#allocation5 + $0x10] sm:$0xff]  ;;  %v227_v6 = vld [vmem:[#allocation5 + $0x28] sm:$0xff]  ;;  %s1123_s20 = sshll.u32 %s1780_s16, 9  ;;  %s1004_s17 = sshll.u32 %s215_s18, 4  ;;  %s1975_s17 = int_to_ptr.vmem [resolvable:$true] %s1004_s17 }
  0x6e   : > { %v229_v7 = vld [vmem:[#allocation5 + $0x38] sm:$0xff]  ;;  %v1306_v8 = vpack.c.bf16 %v224_v5, %v222_v3  ;;  %v226_v10 = vld [vmem:[#allocation5 + $0x20] sm:$0xff]  ;;  %v228_v11 = vld [vmem:[#allocation5 + $0x30] sm:$0xff]  ;;  %s1973_s27 = scalar_lea.hbm %s2021_s3, %s1123_s20  ;;  %s991_s23 = scalar_lea.sflag [#allocation4], %s1923_s28 }
  0x6f   : > { %v1308_v9 = vpack.c.bf16 %v229_v7, %v227_v6  ;;  %v231_v12 = vld [vmem:[#allocation5 + $0x48] sm:$0xff]  ;;  %1305 = vmatprep.subr.bf16.mxu0 %v1304_v4  ;;  %v233_v13 = vld [vmem:[#allocation5 + $0x58] sm:$0xff]  ;;  %v1310_v14 = vpack.c.bf16 %v228_v11, %v226_v10  ;;  %v230_v16 = vld [vmem:[#allocation5 + $0x40] sm:$0xff]  ;;  %s1656_s5 = scalar_lea.vmem %s1975_s17, 512  ;;  %s1736_s16 = smov [#allocation8]  }
  0x70   : > { %1307 = vmatpush1.bf16.msra.mxu0 %v1306_v8  ;;  %v1312_v15 = vpack.c.bf16 %v233_v13, %v231_v12  ;;  %v232_v17 = vld [vmem:[#allocation5 + $0x50] sm:$0xff]  ;;  %v235_v18 = vld [vmem:[#allocation5 + $0x68] sm:$0xff]  ;;  %v237_v19 = vld [vmem:[#allocation5 + $0x78] sm:$0xff]  ;;  %p1657_p1 = scmp.ne.s32.totalorder %s1975_s17, %s1656_s5  ;;  %s1660_s8 = sshll.u32 %s1736_s16, 4  ;;  %s1661_s8 = int_to_ptr.vmem [resolvable:$false] %s1660_s8 }
  0x71   : > { %1309 = vmatprep.subr.bf16.mxu0 %v1308_v9  ;;  %v1314_v20 = vpack.c.bf16 %v232_v17, %v230_v16  ;;  %v1316_v21 = vpack.c.bf16 %v237_v19, %v235_v18  ;;  %v234_v22 = vld [vmem:[#allocation5 + $0x60] sm:$0xff]  ;;  %v236_v23 = vld [vmem:[#allocation5 + $0x70] sm:$0xff]  ;;  %v239_v24 = vld [vmem:[#allocation5 + $0x88] sm:$0xff]  ;;  %s1662_s9 = scalar_lea.vmem %s1661_s8, 1024  ;;  %p1663_p8 = scmp.lt.s32.totalorder %s1975_s17, %s1661_s8 }
  0x72   : > { %v241_v25 = vld [vmem:[#allocation5 + $0x98] sm:$0xff]  ;;  %v238_v26 = vld [vmem:[#allocation5 + $0x80] sm:$0xff]  ;;  %v240_v27 = vld [vmem:[#allocation5 + $0x90] sm:$0xff]  ;;  %v1318_v28 = vpack.c.bf16 %v236_v23, %v234_v22  ;;  %p1658_p2 = pnand %p1657_p1, %p1871_p4  ;;  %p1664_p13 = scmp.lt.s32.totalorder %s1662_s9, %s1656_s5 }
  0x73   : > { %v243_v29 = vld [vmem:[#allocation5 + $0xa8] sm:$0xff]  ;;  %v245_v30 = vld [vmem:[#allocation5 + $0xb8] sm:$0xff]  ;;  %v379_v31 = vld [vmem:[#allocation5 + $0x200] sm:$0xff]  ;;  %v1320_v34 = vpack.c.bf16 %v241_v25, %v239_v24  ;;  %v1322_v45 = vpack.c.bf16 %v240_v27, %v238_v26 }
  0x74   : > { %1311 = vmatpush1.bf16.msra.mxu0 %v1310_v14  ;;  %v380_v32 = vld [vmem:[#allocation5 + $0x210] sm:$0xff]  ;;  %v363_v33 = vld [vmem:[#allocation5 + $0x100] sm:$0xff]  ;;  %v1324_v49 = vpack.c.bf16 %v245_v30, %v243_v29  ;;  %v247_v50 = vld [vmem:[#allocation5 + $0xc8] sm:$0xff]  ;;  %p1659_p6 = pneg %p1658_p2  ;;  %p1665_p3 = por %p1664_p13, %p1663_p8 }
  0x75   : > { %1313 = vmatprep.subr.bf16.mxu0 %v1312_v15  ;;  %v1336_v35 = vpack.c.bf16 %v380_v32, %v379_v31  ;;  %v364_v36 = vld [vmem:[#allocation5 + $0x110] sm:$0xff]  ;;  %v381_v37 = vld [vmem:[#allocation5 + $0x220] sm:$0xff]  ;;  %v249_v54 = vld [vmem:[#allocation5 + $0xd8] sm:$0xff] }
  0x76   : > { %v382_v38 = vld [vmem:[#allocation5 + $0x230] sm:$0xff]  ;;  %v1338_v39 = vpack.c.bf16 %v364_v36, %v363_v33  ;;  %v365_v41 = vld [vmem:[#allocation5 + $0x120] sm:$0xff]  ;;  %v1328_v61 = vpack.c.bf16 %v249_v54, %v247_v50  ;;  %v251_v62 = vld [vmem:[#allocation5 + $0xe8] sm:$0xff]  ;;  %p1666_p7 = pnand %p1665_p3, %p1659_p6 }
  0x77   : > { %v1340_v40 = vpack.c.bf16 %v382_v38, %v381_v37  ;;  %v366_v42 = vld [vmem:[#allocation5 + $0x130] sm:$0xff]  ;;  %v383_v43 = vld [vmem:[#allocation5 + $0x240] sm:$0xff]  ;;  %1337 = vmatprep.subr.bf16.mxu1 %v1336_v35  ;;  %v253_v3 = vld [vmem:[#allocation5 + $0xf8] sm:$0xff] }
  0x78   : > { %1315 = vmatpush1.bf16.msra.mxu0 %v1314_v20  ;;  %v384_v44 = vld [vmem:[#allocation5 + $0x250] sm:$0xff]  ;;  %v242_v46 = vld [vmem:[#allocation5 + $0xa0] sm:$0xff]  ;;  %1339 = vmatpush3.bf16.msra.mxu1 %v1338_v39  ;;  %v1342_v48 = vpack.c.bf16 %v366_v42, %v365_v41  ;;  %v1332_v9 = vpack.c.bf16 %v253_v3, %v251_v62  ;;  %v219_v26 = vld [vmem:[%s1929_s30 + $0x8] sm:$0xff] }
  0x79   : > { %1317 = vmatprep.subr.bf16.mxu0 %v1316_v21  ;;  %v244_v47 = vld [vmem:[#allocation5 + $0xb0] sm:$0xff]  ;;  %1341 = vmatprep.subr.bf16.mxu1 %v1340_v40  ;;  %v1344_v51 = vpack.c.bf16 %v384_v44, %v383_v43  ;;  %v367_v52 = vld [vmem:[#allocation5 + $0x140] sm:$0xff] }
  0x7a   : > { %v368_v53 = vld [vmem:[#allocation5 + $0x150] sm:$0xff]  ;;  %v385_v55 = vld [vmem:[#allocation5 + $0x260] sm:$0xff]  ;;  %v1326_v57 = vpack.c.bf16 %v244_v47, %v242_v46 }
  0x7b   : > { %v386_v56 = vld [vmem:[#allocation5 + $0x270] sm:$0xff]  ;;  %v246_v58 = vld [vmem:[#allocation5 + $0xc0] sm:$0xff]  ;;  %v1346_v60 = vpack.c.bf16 %v368_v53, %v367_v52  ;;  %v256_v53 = vlaneseq }
  0x7c   : > { %1319 = vmatpush1.bf16.msra.mxu0 %v1318_v28  ;;  %v248_v59 = vld [vmem:[#allocation5 + $0xd0] sm:$0xff]  ;;  %1343 = vmatpush3.bf16.msra.mxu1 %v1342_v48  ;;  %v1348_v63 = vpack.c.bf16 %v386_v56, %v385_v55  ;;  %v369_v1 = vld [vmem:[#allocation5 + $0x160] sm:$0xff]  ;;  %v221_v28 = vld [vmem:[%s1929_s30 + $0x18] sm:$0xff] }
  0x7d   : > { %1321 = vmatprep.subr.bf16.mxu0 %v1320_v34  ;;  %1345 = vmatprep.subr.bf16.mxu1 %v1344_v51  ;;  %v370_v2 = vld [vmem:[#allocation5 + $0x170] sm:$0xff]  ;;  %v387_v4 = vld [vmem:[#allocation5 + $0x280] sm:$0xff]  ;;  %v1330_v6 = vpack.c.bf16 %v248_v59, %v246_v58  ;;  %v1947_v54 = vshrl.u32 %v256_v53, 7 }
  0x7e   : > { %v388_v5 = vld [vmem:[#allocation5 + $0x290] sm:$0xff]  ;;  %v250_v7 = vld [vmem:[#allocation5 + $0xe0] sm:$0xff]  ;;  %v1350_v8 = vpack.c.bf16 %v370_v2, %v369_v1 }
  0x7f   : > { %v252_v10 = vld [vmem:[#allocation5 + $0xf0] sm:$0xff]  ;;  %v1352_v11 = vpack.c.bf16 %v388_v5, %v387_v4  ;;  %v371_v12 = vld [vmem:[#allocation5 + $0x180] sm:$0xff]  ;;  %v258_v55 = vsub.s32 0, %v1947_v54 }
  0x80   : > { %1323 = vmatpush1.bf16.msra.mxu0 %v1322_v45  ;;  %1347 = vmatpush3.bf16.msra.mxu1 %v1346_v60  ;;  %v372_v13 = vld [vmem:[#allocation5 + $0x190] sm:$0xff]  ;;  %v389_v14 = vld [vmem:[#allocation5 + $0x2a0] sm:$0xff]  ;;  %v1334_v16 = vpack.c.bf16 %v252_v10, %v250_v7 }
  0x81   : > { %1325 = vmatprep.subr.bf16.mxu0 %v1324_v49  ;;  %1349 = vmatprep.subr.bf16.mxu1 %v1348_v63  ;;  %v390_v15 = vld [vmem:[#allocation5 + $0x2b0] sm:$0xff]  ;;  %v1354_v17 = vpack.c.bf16 %v372_v13, %v371_v12  ;;  %v373_v19 = vld [vmem:[#allocation5 + $0x1a0] sm:$0xff] }
  0x82   : > { %v1356_v18 = vpack.c.bf16 %v390_v15, %v389_v14  ;;  %v374_v20 = vld [vmem:[#allocation5 + $0x1b0] sm:$0xff]  ;;  %v391_v21 = vld [vmem:[#allocation5 + $0x2c0] sm:$0xff] }
  0x83   : > { %v392_v22 = vld [vmem:[#allocation5 + $0x2d0] sm:$0xff]  ;;  %v218_v23 = vld [vmem:[%s1929_s30] sm:$0xff]  ;;  %v1358_v24 = vpack.c.bf16 %v374_v20, %v373_v19 }
  0x84   : > { %1327 = vmatpush1.bf16.msra.mxu0 %v1326_v57  ;;  %1351 = vmatpush3.bf16.msra.mxu1 %v1350_v8  ;;  %v1360_v25 = vpack.c.bf16 %v392_v22, %v391_v21  ;;  %v220_v27 = vld [vmem:[%s1929_s30 + $0x10] sm:$0xff]  ;;  %v375_v29 = vld [vmem:[#allocation5 + $0x1c0] sm:$0xff]  ;;  %v262_v57 = vsub.s32 1, %v1947_v54 }
  0x85   : > { %1329 = vmatprep.subr.bf16.mxu0 %v1328_v61  ;;  %1353 = vmatprep.subr.bf16.mxu1 %v1352_v11  ;;  %v376_v30 = vld [vmem:[#allocation5 + $0x1d0] sm:$0xff]  ;;  %v393_v32 = vld [vmem:[#allocation5 + $0x2e0] sm:$0xff] }
  0x86   : > { %v1362_v31 = vpack.c.bf16 %v376_v30, %v375_v29  ;;  %v394_v33 = vld [vmem:[#allocation5 + $0x2f0] sm:$0xff]  ;;  %v377_v35 = vld [vmem:[#allocation5 + $0x1e0] sm:$0xff] }
  0x87   : > { %v1364_v34 = vpack.c.bf16 %v394_v33, %v393_v32  ;;  %v378_v36 = vld [vmem:[#allocation5 + $0x1f0] sm:$0xff]  ;;  %v485_v38 = vld [vmem:[#allocation5 + $0x300] sm:$0xff] }
  0x88   : > { %1331 = vmatpush1.bf16.msra.mxu0 %v1330_v6  ;;  %1355 = vmatpush3.bf16.msra.mxu1 %v1354_v17  ;;  %v1366_v37 = vpack.c.bf16 %v378_v36, %v377_v35  ;;  %v486_v39 = vld [vmem:[#allocation5 + $0x310] sm:$0xff]  ;;  %v487_v40 = vld [vmem:[#allocation5 + $0x320] sm:$0xff] }
  0x89   : > { %1333 = vmatprep.subr.bf16.mxu0 %v1332_v9  ;;  %1357 = vmatprep.subr.bf16.mxu1 %v1356_v18  ;;  %v1368_v41 = vpack.c.bf16 %v486_v39, %v485_v38  ;;  %v488_v42 = vld [vmem:[#allocation5 + $0x330] sm:$0xff]  ;;  %v489_v44 = vld [vmem:[#allocation5 + $0x340] sm:$0xff] }
  0x8a   : > { %v1372_v43 = vpack.c.bf16 %v488_v42, %v487_v40  ;;  %v490_v45 = vld [vmem:[#allocation5 + $0x350] sm:$0xff]  ;;  %v491_v47 = vld [vmem:[#allocation5 + $0x360] sm:$0xff] }
  0x8b   : > { %v1376_v46 = vpack.c.bf16 %v490_v45, %v489_v44  ;;  %v492_v48 = vld [vmem:[#allocation5 + $0x370] sm:$0xff]  ;;  %v493_v50 = vld [vmem:[#allocation5 + $0x380] sm:$0xff] }
  0x8c   : > { %1335 = vmatpush1.bf16.msra.mxu0 %v1334_v16  ;;  %1359 = vmatpush3.bf16.msra.mxu1 %v1358_v24  ;;  %v1380_v49 = vpack.c.bf16 %v492_v48, %v491_v47  ;;  %v494_v51 = vld [vmem:[#allocation5 + $0x390] sm:$0xff]  ;;  %v254_v56 = vld [vmem:[#allocation7] ss:$8 sm:$0x3]  ;;  %v395_v40 = vld [vmem:[#allocation7 + $0x1] ss:$0 sm:$0xff] }
  0x8d   : > { %1361 = vmatprep.subr.bf16.mxu1 %v1360_v25  ;;  %1369 = vmatprep.subr.bf16.mxu0 %v1368_v41  ;;  %v1384_v52 = vpack.c.bf16 %v494_v51, %v493_v50  ;;  %v259_v58 = vrot.slane %v254_v56, %v258_v55  ;;  %v263_v59 = vrot.slane %v254_v56, %v262_v57  ;;  %v495_v21 = vld [vmem:[#allocation5 + $0x3a0] sm:$0xff]  ;;  %v496_v22 = vld [vmem:[#allocation5 + $0x3b0] sm:$0xff] }
  0x8e   : > { %v497_v24 = vld [vmem:[#allocation5 + $0x3c0] sm:$0xff]  ;;  %v498_v25 = vld [vmem:[#allocation5 + $0x3d0] sm:$0xff] }
  0x8f   : > { %331 = vmatmul.mubr.f32.vlgmr.msra.gmra.mrb[0].mxu0 %v218_v23  ;;  %v1388_v23 = vpack.c.bf16 %v496_v22, %v495_v21  ;;  %v591_v30 = vld [vmem:[#allocation5 + $0x400] sm:$0xff]  ;;  %v711_v21 = vld [vmem:[#allocation5 + $0x4c8] sm:$0xff]  ;;  %v713_v22 = vld [vmem:[#allocation5 + $0x4d8] sm:$0xff] }
  0x90   : > { %336 = vmatprep.mubr.f32.mxu0 %v1735_v0  ;;  %1363 = vmatpush3.bf16.msra.mxu1 %v1362_v31  ;;  %v592_v31 = vld [vmem:[#allocation5 + $0x410] sm:$0xff]  ;;  %v593_v32 = vld [vmem:[#allocation5 + $0x420] sm:$0xff] }
  0x91   : > { %1365 = vmatprep.subr.bf16.mxu1 %v1364_v34  ;;  %1371 = vmatpush3.bf16.msra.mxu0 %v1368_v41  ;;  %v1400_v33 = vpack.c.bf16 %v592_v31, %v591_v30  ;;  %v594_v34 = vld [vmem:[#allocation5 + $0x430] sm:$0xff]  ;;  %v595_v36 = vld [vmem:[#allocation5 + $0x440] sm:$0xff]  ;;  %v715_v31 = vld [vmem:[#allocation5 + $0x4e8] sm:$0xff] }
  0x92   : > { %1373 = vmatprep.subr.bf16.mxu0 %v1372_v43  ;;  %v1404_v35 = vpack.c.bf16 %v594_v34, %v593_v32  ;;  %v717_v32 = vld [vmem:[#allocation5 + $0x4f8] sm:$0xff] }
  0x93   : > { %337 = vmatmul.mubr.f32.gmra.mrb[2].mxu0 %v219_v26  ;;  %v1392_v26 = vpack.c.bf16 %v498_v25, %v497_v24 }
  0x94   : > { %342 = vmatprep.mubr.f32.mxu0 %v1735_v0  ;;  %1367 = vmatpush3.bf16.msra.mxu1 %v1366_v37  ;;  %v596_v37 = vld [vmem:[#allocation5 + $0x450] sm:$0xff] }
  0x95   : > { %1375 = vmatpush3.bf16.msra.mxu0 %v1372_v43  ;;  %1401 = vmatprep.subr.bf16.mxu1 %v1400_v33  ;;  %v1408_v38 = vpack.c.bf16 %v596_v37, %v595_v36  ;;  %v1428_v36 = vpack.c.bf16 %v717_v32, %v715_v31  ;;  %v714_v37 = vld [vmem:[#allocation5 + $0x4e0] sm:$0xff]  ;;  %v853_v32 = vld [vmem:[#allocation5 + $0x610] sm:$0xff] }
  0x96   : > { %1377 = vmatprep.subr.bf16.mxu0 %v1376_v46  ;;  %v852_v31 = vld [vmem:[#allocation5 + $0x600] sm:$0xff] }
  0x97   : > { %343 = vmatmul.mubr.f32.gmra.mrb[4].mxu0 %v220_v27  ;;  %v499_v27 = vld [vmem:[#allocation5 + $0x3e0] sm:$0xff] }
  0x98   : > { %348 = vmatprep.mubr.f32.mxu0 %v1735_v0 }
  0x99   : > { %1379 = vmatpush3.bf16.msra.mxu0 %v1376_v46 }
  0x9a   : > { %1381 = vmatprep.subr.bf16.mxu0 %v1380_v49 }
  0x9b   : > { %349 = vmatmul.mubr.f32.gmra.mrb[6].mxu0 %v221_v28  ;;  %v500_v28 = vld [vmem:[#allocation5 + $0x3f0] sm:$0xff] }
  0x9c   : > { %v1396_v29 = vpack.c.bf16 %v500_v28, %v499_v27  ;;  %v1424_v27 = vpack.c.bf16 %v713_v22, %v711_v21  ;;  %v710_v28 = vld [vmem:[#allocation5 + $0x4c0] sm:$0xff]  ;;  %v867_v22 = vld [vmem:[#allocation5 + $0x6f0] sm:$0xff] }
  0x9d   : > { %1383 = vmatpush3.bf16.msra.mxu0 %v1380_v49  ;;  %v866_v21 = vld [vmem:[#allocation5 + $0x6e0] sm:$0xff] }
  0x9e   : > { %1385 = vmatprep.subr.bf16.mxu0 %v1384_v52 }
  0xa1   : > { %1387 = vmatpush3.bf16.msra.mxu0 %v1384_v52 }
  0xa2   : > { %1389 = vmatprep.subr.bf16.mxu0 %v1388_v23 }
  0xa5   : > { %1391 = vmatpush3.bf16.msra.mxu0 %v1388_v23 }
  0xa6   : > { %1393 = vmatprep.subr.bf16.mxu0 %v1392_v26 }
  0xa9   : > { %1395 = vmatpush3.bf16.msra.mxu0 %v1392_v26 }
  0xaa   : > { %1397 = vmatprep.subr.bf16.mxu0 %v1396_v29 }
  0xad   : > { %1399 = vmatpush3.bf16.msra.mxu0 %v1396_v29  ;;  %v712_v29 = vld [vmem:[#allocation5 + $0x4d0] sm:$0xff] }
  0xae   : > { %v1426_v34 = vpack.c.bf16 %v712_v29, %v710_v28  ;;  %v869_v28 = vld [vmem:[#allocation5 + $0x710] sm:$0xff] }
 0x162   : > { %v332_v60 = vpop.f32.mrb[0].mxu0 }
 0x163   : > { %v333_v61 = vadd.f32 %v332_v60, %v259_v58  ;;  %v334_v62 = vpop.f32.mrb[1].mxu0 }
 0x164   : > { %v335_v63 = vadd.f32 %v334_v62, %v263_v59 }
 0x165   : > { %v355_v3 = vmax.f32 %v333_v61, 0.0 }
 0x166   : > { %v338_v1 = vpop.f32.mrb[2].mxu0  ;;  %v356_v2 = vmax.f32 %v335_v63, 0.0  ;;  %v597_v63 = vld [vmem:[#allocation5 + $0x460] sm:$0xff] }
 0x167   : > { %v339_v4 = vadd.f32 %v338_v1, %v259_v58  ;;  %v340_v5 = vpop.f32.mrb[3].mxu0  ;;  %v598_v1 = vld [vmem:[#allocation5 + $0x470] sm:$0xff] }
 0x168   : > { %v341_v6 = vadd.f32 %v340_v5, %v263_v59  ;;  %460 = vmatprep.mubr.f32.mxu1 %v356_v2  ;;  %v1412_v2 = vpack.c.bf16 %v598_v1, %v597_v63  ;;  %v730_v1 = vld [vmem:[#allocation5 + $0x560] sm:$0xff] }
 0x169   : > { %461 = vmatmul.mubr.f32.vlgmr.msra.gmra.mrb[0].mxu1 %v355_v3  ;;  %v357_v9 = vmax.f32 %v339_v4, 0.0  ;;  %v703_v3 = vld [vmem:[#allocation5 + $0x488] sm:$0xff]  ;;  %v705_v4 = vld [vmem:[#allocation5 + $0x498] sm:$0xff] }
 0x16a   : > { %v358_v7 = vmax.f32 %v341_v6, 0.0  ;;  %v344_v8 = vpop.f32.mrb[4].mxu0  ;;  %1403 = vmatpush3.bf16.msra.mxu1 %v1400_v33  ;;  %v1416_v5 = vpack.c.bf16 %v705_v4, %v703_v3  ;;  %v501_v6 = vld [vmem:[#allocation7 + $0x2] ss:$0 sm:$0xff] }
 0x16b   : > { %v345_v10 = vadd.f32 %v344_v8, %v259_v58  ;;  %v346_v11 = vpop.f32.mrb[5].mxu0  ;;  %1405 = vmatprep.subr.bf16.mxu1 %v1404_v35  ;;  %v860_v4 = vld [vmem:[#allocation5 + $0x680] sm:$0xff] }
 0x16c   : > { %v347_v12 = vadd.f32 %v346_v11, %v263_v59  ;;  %465 = vmatprep.mubr.f32.mxu1 %v358_v7  ;;  %v704_v11 = vld [vmem:[#allocation5 + $0x490] sm:$0xff] }
 0x16d   : > { %466 = vmatmul.mubr.f32.gmra.mrb[2].mxu1 %v357_v9  ;;  %v359_v15 = vmax.f32 %v345_v10, 0.0  ;;  %v702_v10 = vld [vmem:[#allocation5 + $0x480] sm:$0xff] }
 0x16e   : > { %v360_v13 = vmax.f32 %v347_v12, 0.0  ;;  %v350_v14 = vpop.f32.mrb[6].mxu0  ;;  %1407 = vmatpush3.bf16.msra.mxu1 %v1404_v35 }
 0x16f   : > { %v351_v16 = vadd.f32 %v350_v14, %v259_v58  ;;  %v352_v17 = vpop.f32.mrb[7].mxu0  ;;  %1409 = vmatprep.subr.bf16.mxu1 %v1408_v38  ;;  %v709_v14 = vld [vmem:[#allocation5 + $0x4b8] sm:$0xff] }
 0x170   : > { %v353_v18 = vadd.f32 %v352_v17, %v263_v59  ;;  %470 = vmatprep.mubr.f32.mxu1 %v360_v13  ;;  %v707_v13 = vld [vmem:[#allocation5 + $0x4a8] sm:$0xff] }
 0x171   : > { %471 = vmatmul.mubr.f32.gmra.mrb[4].mxu1 %v359_v15  ;;  %v361_v20 = vmax.f32 %v351_v16, 0.0  ;;  %v1418_v16 = vpack.c.bf16 %v704_v11, %v702_v10  ;;  %v863_v10 = vld [vmem:[#allocation5 + $0x6b0] sm:$0xff] }
 0x172   : > { %v362_v19 = vmax.f32 %v353_v18, 0.0  ;;  %1411 = vmatpush3.bf16.msra.mxu1 %v1408_v38  ;;  %v1420_v18 = vpack.c.bf16 %v709_v14, %v707_v13  ;;  %v716_v38 = vld [vmem:[#allocation5 + $0x4f0] sm:$0xff]  ;;  %v846_v13 = vld [vmem:[#allocation5 + $0x5a0] sm:$0xff] }
 0x173   : > { %1413 = vmatprep.subr.bf16.mxu1 %v1412_v2  ;;  %v847_v14 = vld [vmem:[#allocation5 + $0x5b0] sm:$0xff] }
 0x174   : > { %475 = vmatprep.mubr.f32.mxu1 %v362_v19  ;;  %v706_v19 = vld [vmem:[#allocation5 + $0x4a0] sm:$0xff] }
 0x175   : > { %476 = vmatmul.mubr.f32.gmra.mrb[6].mxu1 %v361_v20  ;;  %v708_v20 = vld [vmem:[#allocation5 + $0x4b0] sm:$0xff] }
 0x176   : > { %1415 = vmatpush3.bf16.msra.mxu1 %v1412_v2  ;;  %v1422_v24 = vpack.c.bf16 %v708_v20, %v706_v19  ;;  %v732_v2 = vld [vmem:[#allocation5 + $0x570] sm:$0xff]  ;;  %v848_v19 = vld [vmem:[#allocation5 + $0x5c0] sm:$0xff] }
 0x177   : > { %1417 = vmatprep.subr.bf16.mxu1 %v1416_v5  ;;  %v1446_v3 = vpack.c.bf16 %v732_v2, %v730_v1  ;;  %v861_v5 = vld [vmem:[#allocation5 + $0x690] sm:$0xff]  ;;  %v858_v2 = vld [vmem:[#allocation5 + $0x660] sm:$0xff] }
 0x178   : > { %v849_v20 = vld [vmem:[#allocation5 + $0x5d0] sm:$0xff] }
 0x23c   : > { %v1156_v39 = vpop.f32.mrb[0].mxu1 }
 0x23d   : > { %v1157_v41 = vpop.f32.mrb[1].mxu1 }
 0x23e   : > { %v1158_v42 = vadd.f32 %v1157_v41, %v1156_v39  ;;  %v719_v39 = vld [vmem:[#allocation5 + $0x508] sm:$0xff]  ;;  %v1430_v41 = vpack.c.bf16 %v716_v38, %v714_v37  ;;  %v854_v37 = vld [vmem:[#allocation5 + $0x620] sm:$0xff]  ;;  %v855_v38 = vld [vmem:[#allocation5 + $0x630] sm:$0xff] }
 0x240   : > { %v463_v43 = vadd.f32 %v1158_v42, %v395_v40  ;;  %v1159_v44 = vpop.f32.mrb[2].mxu1 }
 0x241   : > { %v1160_v45 = vpop.f32.mrb[3].mxu1 }
 0x242   : > { %v481_v46 = vmax.f32 %v463_v43, 0.0  ;;  %v1161_v47 = vadd.f32 %v1160_v45, %v1159_v44  ;;  %v718_v43 = vld [vmem:[#allocation5 + $0x500] sm:$0xff]  ;;  %v720_v44 = vld [vmem:[#allocation5 + $0x510] sm:$0xff]  ;;  %v723_v45 = vld [vmem:[#allocation5 + $0x528] sm:$0xff] }
 0x244   : > { %v468_v48 = vadd.f32 %v1161_v47, %v395_v40  ;;  %v1162_v49 = vpop.f32.mrb[4].mxu1  ;;  %1276 = vmatprep.mubr.f32.mxu0 %v481_v46  ;;  %v725_v46 = vld [vmem:[#allocation5 + $0x538] sm:$0xff]  ;;  %v1434_v47 = vpack.c.bf16 %v720_v44, %v718_v43  ;;  %v599_v43 = vld [vmem:[#allocation7 + $0x3] ss:$0 sm:$0xff] }
 0x245   : > { %v1163_v50 = vpop.f32.mrb[5].mxu1 }
 0x246   : > { %v482_v51 = vmax.f32 %v468_v48, 0.0  ;;  %v1164_v52 = vadd.f32 %v1163_v50, %v1162_v49  ;;  %v1436_v48 = vpack.c.bf16 %v725_v46, %v723_v45  ;;  %v722_v49 = vld [vmem:[#allocation5 + $0x520] sm:$0xff]  ;;  %v724_v50 = vld [vmem:[#allocation5 + $0x530] sm:$0xff] }
 0x248   : > { %v473_v53 = vadd.f32 %v1164_v52, %v395_v40  ;;  %v1165_v56 = vpop.f32.mrb[6].mxu1  ;;  %1277 = vmatmul.mubr.f32.vlgmr.msra.gmra.mrb[8].mxu0 %v482_v51  ;;  %v727_v51 = vld [vmem:[#allocation5 + $0x548] sm:$0xff]  ;;  %v729_v52 = vld [vmem:[#allocation5 + $0x558] sm:$0xff] }
 0x249   : > { %v1166_v58 = vpop.f32.mrb[7].mxu1 }
 0x24a   : > { %v483_v59 = vmax.f32 %v473_v53, 0.0  ;;  %v1167_v60 = vadd.f32 %v1166_v58, %v1165_v56  ;;  %v1438_v53 = vpack.c.bf16 %v724_v50, %v722_v49  ;;  %v1440_v56 = vpack.c.bf16 %v729_v52, %v727_v51  ;;  %v726_v58 = vld [vmem:[#allocation5 + $0x540] sm:$0xff] }
 0x24c   : > { %v478_v61 = vadd.f32 %v1167_v60, %v395_v40  ;;  %1279 = vmatprep.mubr.f32.mxu0 %v483_v59  ;;  %v721_v40 = vld [vmem:[#allocation5 + $0x518] sm:$0xff]  ;;  %v728_v59 = vld [vmem:[#allocation5 + $0x550] sm:$0xff] }
 0x24d   : > { %v1432_v42 = vpack.c.bf16 %v721_v40, %v719_v39  ;;  %v1442_v60 = vpack.c.bf16 %v728_v59, %v726_v58  ;;  %v872_v39 = vld [vmem:[#allocation5 + $0x740] sm:$0xff]  ;;  %v873_v40 = vld [vmem:[#allocation5 + $0x750] sm:$0xff] }
 0x24e   : > { %v484_v62 = vmax.f32 %v478_v61, 0.0  ;;  %v731_v61 = vld [vmem:[#allocation5 + $0x568] sm:$0xff]  ;;  %v856_v59 = vld [vmem:[#allocation5 + $0x640] sm:$0xff] }
 0x250   : > { %1280 = vmatmul.mubr.f32.gmra.mrb[10].mxu0 %v484_v62  ;;  %v733_v62 = vld [vmem:[#allocation5 + $0x578] sm:$0xff] }
 0x251   : > { %v1444_v63 = vpack.c.bf16 %v733_v62, %v731_v61  ;;  %v874_v62 = vld [vmem:[#allocation5 + $0x760] sm:$0xff] }
 0x31b   : > { %v1278_v7 = vpop.f32.mrb[8].mxu0 }
 0x31c   : > { %v574_v8 = vadd.f32 %v1278_v7, %v501_v6  ;;  %v568_v9 = vpop.f32.mrb[9].mxu0  ;;  %v1448_v7 = vpack.c.bf16 %v861_v5, %v860_v4  ;;  %v735_v5 = vld [vmem:[#allocation7 + $0x4] ss:$8 sm:$0x3] }
 0x31d   : > { %v569_v12 = vadd.f32 %v568_v9, %v501_v6  ;;  %v862_v9 = vld [vmem:[#allocation5 + $0x6a0] sm:$0xff] }
 0x31e   : > { %v588_v17 = vmax.f32 %v574_v8, 0.0  ;;  %v845_v8 = vld [vmem:[#allocation5 + $0x590] sm:$0xff]  ;;  %1449 = vmatprep.subr.bf16.mxu0 %v1448_v7 }
 0x31f   : > { %v587_v15 = vmax.f32 %v569_v12, 0.0  ;;  %v1452_v12 = vpack.c.bf16 %v863_v10, %v862_v9 }
 0x321   : > { %1298 = vmatprep.mubr.msk.f32.mxu1 %vm600_vm0, %v587_v15  ;;  %v864_v15 = vld [vmem:[#allocation5 + $0x6c0] sm:$0xff] }
 0x322   : > { %1299 = vmatmul.mubr.msk.f32.vlgmr.msra.gmra.mrb[8].mxu1 %vm600_vm0, %v588_v17  ;;  %v1454_v17 = vpack.c.bf16 %v847_v14, %v846_v13 }
 0x323   : > { %v1281_v23 = vpop.f32.mrb[10].mxu0  ;;  %1419 = vmatpush1.bf16.msra.mxu1 %v1418_v16  ;;  %v865_v16 = vld [vmem:[#allocation5 + $0x6d0] sm:$0xff] }
 0x324   : > { %v584_v25 = vadd.f32 %v1281_v23, %v501_v6  ;;  %v578_v26 = vpop.f32.mrb[11].mxu0  ;;  %1421 = vmatprep.subr.bf16.mxu1 %v1420_v18  ;;  %v1456_v18 = vpack.c.bf16 %v865_v16, %v864_v15  ;;  %v1458_v23 = vpack.c.bf16 %v849_v20, %v848_v19 }
 0x325   : > { %v579_v30 = vadd.f32 %v578_v26, %v501_v6  ;;  %v844_v6 = vld [vmem:[#allocation5 + $0x580] sm:$0xff]  ;;  %v851_v26 = vld [vmem:[#allocation5 + $0x5f0] sm:$0xff] }
 0x326   : > { %v590_v35 = vmax.f32 %v584_v25, 0.0  ;;  %v1450_v11 = vpack.c.bf16 %v845_v8, %v844_v6  ;;  %v850_v25 = vld [vmem:[#allocation5 + $0x5e0] sm:$0xff]  ;;  %v740_v6 = vrot.slane %v735_v5, %v258_v55 }
 0x327   : > { %v589_v33 = vmax.f32 %v579_v30, 0.0  ;;  %1423 = vmatpush1.bf16.msra.mxu1 %v1422_v24  ;;  %v1460_v24 = vpack.c.bf16 %v867_v22, %v866_v21  ;;  %v1462_v29 = vpack.c.bf16 %v851_v26, %v850_v25 }
 0x328   : > { %1425 = vmatprep.subr.bf16.mxu1 %v1424_v27  ;;  %1451 = vmatpush3.bf16.msra.mxu0 %v1450_v11  ;;  %v868_v27 = vld [vmem:[#allocation5 + $0x700] sm:$0xff] }
 0x329   : > { %1301 = vmatprep.mubr.msk.f32.mxu1 %vm600_vm0, %v589_v33  ;;  %1453 = vmatprep.subr.bf16.mxu0 %v1452_v12  ;;  %v1464_v30 = vpack.c.bf16 %v869_v28, %v868_v27  ;;  %v870_v33 = vld [vmem:[#allocation5 + $0x720] sm:$0xff] }
 0x32a   : > { %1302 = vmatmul.mubr.msk.f32.gmra.mrb[10].mxu1 %vm600_vm0, %v590_v35  ;;  %v1466_v35 = vpack.c.bf16 %v853_v32, %v852_v31 }
 0x32b   : > { %1427 = vmatpush1.bf16.msra.mxu1 %v1426_v34  ;;  %811 = vmatprep.mubr.f32.mxu1 %v1735_v0  ;;  %v871_v34 = vld [vmem:[#allocation5 + $0x730] sm:$0xff] }
 0x32c   : > { %1429 = vmatprep.subr.bf16.mxu1 %v1428_v36  ;;  %1455 = vmatpush3.bf16.msra.mxu0 %v1454_v17  ;;  %v1468_v36 = vpack.c.bf16 %v871_v34, %v870_v33 }
 0x32d   : > { %1457 = vmatprep.subr.bf16.mxu0 %v1456_v18 }
 0x32f   : > { %1431 = vmatpush1.bf16.msra.mxu1 %v1430_v41  ;;  %v1470_v41 = vpack.c.bf16 %v855_v38, %v854_v37 }
 0x330   : > { %1433 = vmatprep.subr.bf16.mxu1 %v1432_v42  ;;  %1459 = vmatpush3.bf16.msra.mxu0 %v1458_v23  ;;  %v1472_v42 = vpack.c.bf16 %v873_v40, %v872_v39 }
 0x331   : > { %1461 = vmatprep.subr.bf16.mxu0 %v1460_v24 }
 0x333   : > { %1435 = vmatpush1.bf16.msra.mxu1 %v1434_v47 }
 0x334   : > { %1437 = vmatprep.subr.bf16.mxu1 %v1436_v48  ;;  %1463 = vmatpush3.bf16.msra.mxu0 %v1462_v29  ;;  %v876_v29 = vld [vmem:[#allocation7 + $0x5] ss:$0 sm:$0xff] }
 0x335   : > { %1465 = vmatprep.subr.bf16.mxu0 %v1464_v30 }
 0x337   : > { %1439 = vmatpush1.bf16.msra.mxu1 %v1438_v53 }
 0x338   : > { %1441 = vmatprep.subr.bf16.mxu1 %v1440_v56  ;;  %1467 = vmatpush3.bf16.msra.mxu0 %v1466_v35 }
 0x339   : > { %1469 = vmatprep.subr.bf16.mxu0 %v1468_v36 }
 0x33b   : > { %1443 = vmatpush1.bf16.msra.mxu1 %v1442_v60  ;;  %v857_v60 = vld [vmem:[#allocation5 + $0x650] sm:$0xff] }
 0x33c   : > { %1445 = vmatprep.subr.bf16.mxu1 %v1444_v63  ;;  %1471 = vmatpush3.bf16.msra.mxu0 %v1470_v41  ;;  %v1474_v61 = vpack.c.bf16 %v857_v60, %v856_v59  ;;  %v875_v63 = vld [vmem:[#allocation5 + $0x770] sm:$0xff] }
 0x33d   : > { %1473 = vmatprep.subr.bf16.mxu0 %v1472_v42  ;;  %v1476_v1 = vpack.c.bf16 %v875_v63, %v874_v62 }
 0x33f   : > { %1447 = vmatpush1.bf16.msra.mxu1 %v1446_v3  ;;  %v859_v3 = vld [vmem:[#allocation5 + $0x670] sm:$0xff] }
 0x340   : > { %1475 = vmatpush3.bf16.msra.mxu0 %v1474_v61  ;;  %v1478_v4 = vpack.c.bf16 %v859_v3, %v858_v2 }
 0x341   : > { %1477 = vmatprep.subr.bf16.mxu0 %v1476_v1 }
 0x344   : > { %1479 = vmatpush3.bf16.msra.mxu0 %v1478_v4 }
 0x3f5   : > { %v1300_v44 = vpop.f32.mrb[8].mxu1 }
 0x3f6   : > { %v679_v45 = vpop.f32.mrb[9].mxu1  ;;  %v685_v47 = vadd.f32 %v1300_v44, %v599_v43 }
 0x3f7   : > { %v680_v46 = vadd.f32 %v679_v45, %v599_v43 }
 0x3f8   : > { %v699_v49 = vmax.f32 %v685_v47, 0.0 }
 0x3f9   : > { %v698_v48 = vmax.f32 %v680_v46, 0.0 }
 0x3fb   : > { %812 = vmatmul.mubr.f32.vlgmr.msra.gmra.mrb[12].mxu1 %v698_v48 }
 0x3fc   : > { %817 = vmatprep.mubr.f32.mxu1 %v1735_v0 }
 0x3fd   : > { %v1303_v50 = vpop.f32.mrb[10].mxu1 }
 0x3fe   : > { %v689_v51 = vpop.f32.mrb[11].mxu1  ;;  %v695_v53 = vadd.f32 %v1303_v50, %v599_v43 }
 0x3ff   : > { %v690_v52 = vadd.f32 %v689_v51, %v599_v43  ;;  %818 = vmatmul.mubr.f32.gmra.mrb[14].mxu1 %v699_v49 }
 0x400   : > { %823 = vmatprep.mubr.f32.mxu1 %v1735_v0  ;;  %v701_v58 = vmax.f32 %v695_v53, 0.0 }
 0x401   : > { %v700_v56 = vmax.f32 %v690_v52, 0.0 }
 0x403   : > { %824 = vmatmul.mubr.f32.gmra.mrb[16].mxu1 %v700_v56 }
 0x404   : > { %829 = vmatprep.mubr.f32.mxu1 %v1735_v0  ;;  %v744_v0 = vrot.slane %v735_v5, %v262_v57 }
 0x407   : > { %830 = vmatmul.mubr.f32.gmra.mrb[18].mxu1 %v701_v58 }
 0x4ce   : > { %v813_v7 = vpop.f32.mrb[12].mxu1 }
 0x4cf   : > { %v814_v8 = vadd.f32 %v813_v7, %v740_v6  ;;  %v815_v9 = vpop.f32.mrb[13].mxu1 }
 0x4d0   : > { %v816_v10 = vadd.f32 %v815_v9, %v744_v0 }
 0x4d1   : > { %v836_v13 = vmax.f32 %v814_v8, 0.0 }
 0x4d2   : > { %v837_v11 = vmax.f32 %v816_v10, 0.0  ;;  %v819_v12 = vpop.f32.mrb[14].mxu1 }
 0x4d3   : > { %v820_v14 = vadd.f32 %v819_v12, %v740_v6  ;;  %v821_v15 = vpop.f32.mrb[15].mxu1 }
 0x4d4   : > { %v822_v16 = vadd.f32 %v821_v15, %v744_v0  ;;  %941 = vmatprep.mubr.f32.mxu0 %v837_v11 }
 0x4d5   : > { %942 = vmatmul.mubr.f32.vlgmr.msra.gmra.mrb[12].mxu0 %v836_v13  ;;  %v838_v19 = vmax.f32 %v820_v14, 0.0 }
 0x4d6   : > { %v839_v17 = vmax.f32 %v822_v16, 0.0  ;;  %v825_v18 = vpop.f32.mrb[16].mxu1 }
 0x4d7   : > { %v826_v20 = vadd.f32 %v825_v18, %v740_v6  ;;  %v827_v55 = vpop.f32.mrb[17].mxu1 }
 0x4d8   : > { %v828_v21 = vadd.f32 %v827_v55, %v744_v0  ;;  %946 = vmatprep.mubr.f32.mxu0 %v839_v17 }
 0x4d9   : > { %947 = vmatmul.mubr.f32.gmra.mrb[14].mxu0 %v838_v19  ;;  %v840_v22 = vmax.f32 %v826_v20, 0.0 }
 0x4da   : > { %v841_v54 = vmax.f32 %v828_v21, 0.0  ;;  %v831_v57 = vpop.f32.mrb[18].mxu1 }
 0x4db   : > { %v832_v23 = vadd.f32 %v831_v57, %v740_v6  ;;  %v833_v24 = vpop.f32.mrb[19].mxu1 }
 0x4dc   : > { %v834_v25 = vadd.f32 %v833_v24, %v744_v0  ;;  %951 = vmatprep.mubr.f32.mxu0 %v841_v54 }
 0x4dd   : > { %952 = vmatmul.mubr.f32.gmra.mrb[16].mxu0 %v840_v22  ;;  %v842_v27 = vmax.f32 %v832_v23, 0.0 }
 0x4de   : > { %v843_v26 = vmax.f32 %v834_v25, 0.0 }
 0x4e0   : > { %956 = vmatprep.mubr.f32.mxu0 %v843_v26 }
 0x4e1   : > { %957 = vmatmul.mubr.f32.gmra.mrb[18].mxu0 %v842_v27 }
 0x5a8   : > { %v1232_v28 = vpop.f32.mrb[12].mxu0 }
 0x5a9   : > { %v1233_v30 = vpop.f32.mrb[13].mxu0 }
 0x5aa   : > { %v1234_v31 = vadd.f32 %v1233_v30, %v1232_v28 }
 0x5ac   : > { %v944_v32 = vadd.f32 %v1234_v31, %v876_v29  ;;  %v1235_v33 = vpop.f32.mrb[14].mxu0 }
 0x5ad   : > { %v1236_v34 = vpop.f32.mrb[15].mxu0 }
 0x5ae   : > { %v1113_v35 = vmul.f32 -1.442695, %v944_v32  ;;  %v1237_v36 = vadd.f32 %v1236_v34, %v1235_v33 }
 0x5b0   : > { %1554 = vpow2.f32 %v1113_v35  ;;  %v949_v37 = vadd.f32 %v1237_v36, %v876_v29  ;;  %v1238_v38 = vpop.f32.mrb[16].mxu0 }
 0x5b1   : > { %v1239_v39 = vpop.f32.mrb[17].mxu0 }
 0x5b2   : > { %v1114_v40 = vmul.f32 -1.442695, %v949_v37  ;;  %v1240_v41 = vadd.f32 %v1239_v39, %v1238_v38 }
 0x5b4   : > { %1556 = vpow2.f32 %v1114_v40  ;;  %v954_v42 = vadd.f32 %v1240_v41, %v876_v29  ;;  %v1241_v43 = vpop.f32.mrb[18].mxu0 }
 0x5b5   : > { %v1242_v44 = vpop.f32.mrb[19].mxu0 }
 0x5b6   : > { %v1115_v45 = vmul.f32 -1.442695, %v954_v42  ;;  %v1243_v46 = vadd.f32 %v1242_v44, %v1241_v43 }
 0x5b8   : > { %1558 = vpow2.f32 %v1115_v45  ;;  %v959_v47 = vadd.f32 %v1243_v46, %v876_v29 }
 0x5ba   : > { %v1555_v48 = vpop.eup %1554  ;;  %v1116_v49 = vmul.f32 -1.442695, %v959_v47 }
 0x5bb   : > { %v974_v50 = vadd.f32 1.0, %v1555_v48 }
 0x5bc   : > { %1560 = vpow2.f32 %v1116_v49 }
 0x5bd   : > { %1562 = vrcp.f32 %v974_v50 }
 0x5be   : > { %v1557_v51 = vpop.eup %1556 }
 0x5bf   : > { %v975_v52 = vadd.f32 1.0, %v1557_v51 }
 0x5c1   : > { %1564 = vrcp.f32 %v975_v52 }
 0x5c2   : > { %v1559_v53 = vpop.eup %1558 }
 0x5c3   : > { %v976_v56 = vadd.f32 1.0, %v1559_v53 }
 0x5c5   : > { %1566 = vrcp.f32 %v976_v56 }
 0x5c6   : > { %v1561_v58 = vpop.eup %1560 }
 0x5c7   : > { %v1563_v59 = vpop.eup %1562  ;;  %v977_v60 = vadd.f32 1.0, %v1561_v58 }
 0x5c8   : > { %986 = vst [vmem:[%s215_s18] sm:$0xff] %v1563_v59 }
 0x5c9   : > { %1568 = vrcp.f32 %v977_v60 }
 0x5cb   : > { %v1565_v61 = vpop.eup %1564 }
 0x5cc   : > { %987 = vst [vmem:[%s215_s18 + $0x8] sm:$0xff] %v1565_v61 }
 0x5cf   : > { %v1567_v62 = vpop.eup %1566 }
 0x5d0   : > { %988 = vst [vmem:[%s215_s18 + $0x10] sm:$0xff] %v1567_v62 }
 0x5d3   : > { %v1569_v63 = vpop.eup %1568 }
 0x5d4   : > { %989 = vst [vmem:[%s215_s18 + $0x18] sm:$0xff] %v1569_v63 }
 0x5d5   : > { %1669 = shalt.err (!%p1666_p7)
}
 0x5d6   : > { %s1670_s25 = scalar_lea.hbm %s1973_s27, 512  ;;  %s1674_s21 = scalar_lea.hbm %s2021_s3, 2048 }
 0x5d7   : > { %p1671_p9 = scmp.ne.s32.totalorder %s1973_s27, %s1670_s25  ;;  %p1675_p5 = scmp.lt.u32.totalorder %s1973_s27, %s2021_s3 }
 0x5d8   : > { %p1676_p10 = scmp.lt.u32.totalorder %s1674_s21, %s1670_s25  ;;  %p1678_p1 = scmp.lt.u32.totalorder %s1670_s25, %s1973_s27 }
 0x5d9   : > { %p1672_p12 = pnand %p1671_p9, %p1871_p4 }
 0x5da   : > { %p1677_p11 = por %p1676_p10, %p1675_p5 }
 0x5db   : > { %p1673_p0 = pneg %p1672_p12 }
 0x5dc   : > { %p1679_p2 = por %p1678_p1, %p1677_p11 }
 0x5de   : > { %p1680_p6 = pnand %p1679_p2, %p1673_p0 }
 0x5e0   : > { %1683 = shalt.err (!%p1680_p6)
}
 0x5e1   : > { %s1737_s30 = smov 128   ;;  %s1738_s18 = smov 8  }
 0x5e2   : > { %1490 = dma.vmem_to_hbm [thread:$0]  (%p1871_p4), %s1975_s17, 512, %s1973_s27, %s991_s23, %s1737_s30, %s1737_s30, %s1738_s18  }
 0x5e3 PF: > { %p1512_p8 = scmp.ge.s32.totalorder %s1726_s15, 2  ;;  %s1019_s20 = sand.u32 1, %s1714_s12  }
 0x5e4   : > { %p2036_p13 = scmp.ne.s32.totalorder %s2026_s19, 0  ;;  %s1020_s24 = scalar_lea.sflag [#allocation4], %s1019_s20 }
 0x5e6   : > { %p1504_p3 = pnand %p1512_p8, %p2036_p13 }
 0x5e8   : > { %1709 = dma.done.wait (!%p1504_p3), %s1020_s24, 512  }
 0x5e9   : > { %1711 = vsyncadd (!%p1504_p3), %s1020_s24, 4294966784  ;;  %p17_p7 = scmp.ge.s32.totalorder %s1861_s4, 6   ;;  %s2037_s12 = smov %s1718_s13 }
 0x5ea   : > { %s2038_s13 = smov %s1722_s14  ;;  %s2039_s14 = smov %s1877_s7 }
 0x5eb   : > { %s2040_s15 = smov %s1861_s4  ;;  %19 = sbr.rel (!%p17_p7) target bundleno = 6 (0x6), region = 86 }
 0x5f2   :  { %1025 = vsyncpa [#allocation3], 1 }
 0x5f3   :  { %1027 = vsyncpa [#allocation3 + $0x1], 1 }
 0x5f4   :  { %1028 = vsyncpa [#allocation6], 1 }
 0x5f5   :  { %1029 = vsyncpa [#allocation4], 1 }
 0x5f6   :  { %1031 = vsyncpa [#allocation4 + $0x1], 1 }

</bundles_post_ra>
